<compile_context>
chip_gen: v6e
topology: v6e:2x2x1
jax: 0.10.0
libtpu: 0.0.40
codegen_flags: <defaults>
</compile_context>

<pallas_src>
import jax
import jax.numpy as jnp
from jax.experimental import pallas as pl
from jax.experimental.pallas import tpu as pltpu


def agent_rollout_kernel(x_ref, h0_ref, c0_ref, w_ref, b_ref, wa_ref, ba_ref,
                         p_ref, hT_ref, cT_ref, h_sc, c_sc):
    t = pl.program_id(0)
    S = x_ref.shape[-1]
    H = h_sc.shape[-1]

    # Load initial memory into the VMEM carry at the first grid step.
    @pl.when(t == 0)
    def _init():
        h_sc[...] = h0_ref[...]
        c_sc[...] = c0_ref[...]

    x = x_ref[...]            # [B, S]  f32
    h = h_sc[...]             # [B, H]
    c = c_sc[...]             # [B, H]

    # Stacked, pre-transposed weight [S+H, 4H]; sublane-aligned row slices.
    w = w_ref[...]
    gates = (jnp.dot(x, w[:S, :], preferred_element_type=jnp.float32)
             + jnp.dot(h, w[S:, :], preferred_element_type=jnp.float32)
             + b_ref[...])                              # [B, 4H]

    # Whole-vreg activations: sigmoid/tanh on the full [B, 4H] tile, then a
    # lane-index select picks tanh for the g-gate region (lanes [2H, 3H)).
    sig = jax.nn.sigmoid(gates)
    th = jnp.tanh(gates)
    lane = jax.lax.broadcasted_iota(jnp.int32, gates.shape, 1)
    act = jnp.where((lane >= 2 * H) & (lane < 3 * H), th, sig)

    i_g = act[:, 0 * H:1 * H]
    f_g = act[:, 1 * H:2 * H]
    g_g = act[:, 2 * H:3 * H]
    o_g = act[:, 3 * H:4 * H]

    c_new = f_g * c + i_g * g_g
    h_new = o_g * jnp.tanh(c_new)

    # Action head: Linear + Softmax(dim=-1), approx reciprocal on EUP.
    logits = jnp.dot(h_new, wa_ref[...], preferred_element_type=jnp.float32) + ba_ref[...]
    m = jnp.max(logits, axis=-1, keepdims=True)
    e = jnp.exp(logits - m)
    probs = e * pl.reciprocal(jnp.sum(e, axis=-1, keepdims=True), approx=True)

    # Carry state in VMEM scratch; emit per-step action probabilities.
    h_sc[...] = h_new
    c_sc[...] = c_new
    p_ref[...] = probs.astype(p_ref.dtype)

    # Final memory written back once, at the last step.
    @pl.when(t == pl.num_programs(0) - 1)
    def _final():
        hT_ref[...] = h_sc[...]
        cT_ref[...] = c_sc[...]


def prepare_agent_params(w_ih, w_hh, b_ih, b_hh, w_a, b_a):
    """One-time parameter preprocessing (hoisted out of the per-step path).

    PyTorch layouts: w_ih [4H,S], w_hh [4H,H], b_ih/b_hh [4H], w_a [A,H], b_a [A].
    Returns (w [S+H,4H], b [1,4H], wa [H,A], ba [1,A]).
    """
    w = jnp.concatenate([w_ih.T, w_hh.T], axis=0)        # [S+H, 4H]
    b = (b_ih + b_hh).reshape(1, -1)                     # [1, 4H]
    wa = w_a.T                                           # [H, A]
    ba = b_a.reshape(1, -1)                              # [1, A]
    return w, b, wa, ba


@jax.jit
def agent_policy_rollout(xs, h0, c0, w, b, wa, ba):
    """Run T fused policy steps.

    xs: [T, B, S] states; h0/c0: [B, H]; params from prepare_agent_params.
    Returns (action_probs [T, B, A], h_final [B, H], c_final [B, H]).
    """
    T, B, S = xs.shape
    H = h0.shape[-1]
    A = wa.shape[-1]
    G = 4 * H

    cost = pl.CostEstimate(
        flops=int(T * (2 * B * (S + H) * G + 2 * B * H * A)),
        transcendentals=int(T * B * (2 * G + H + A)),
        bytes_accessed=int(4 * (xs.size + h0.size + c0.size + w.size + b.size
                                + wa.size + ba.size + T * B * A + 2 * B * H)),
    )

    return pl.pallas_call(
        agent_rollout_kernel,
        grid=(T,),
        in_specs=[
            pl.BlockSpec((None, B, S), lambda t: (t, 0, 0)),   # x_t
            pl.BlockSpec((B, H), lambda t: (0, 0)),            # h0 (resident)
            pl.BlockSpec((B, H), lambda t: (0, 0)),            # c0 (resident)
            pl.BlockSpec((S + H, G), lambda t: (0, 0)),        # stacked W (resident)
            pl.BlockSpec((1, G), lambda t: (0, 0)),            # folded bias (resident)
            pl.BlockSpec((H, A), lambda t: (0, 0)),            # action W^T (resident)
            pl.BlockSpec((1, A), lambda t: (0, 0)),            # action bias (resident)
        ],
        out_specs=(
            pl.BlockSpec((None, B, A), lambda t: (t, 0, 0)),   # probs_t
            pl.BlockSpec((B, H), lambda t: (0, 0)),            # final h
            pl.BlockSpec((B, H), lambda t: (0, 0)),            # final c
        ),
        out_shape=(
            jax.ShapeDtypeStruct((T, B, A), jnp.float32),
            jax.ShapeDtypeStruct((B, H), jnp.float32),
            jax.ShapeDtypeStruct((B, H), jnp.float32),
        ),
        scratch_shapes=[
            pltpu.VMEM((B, H), jnp.float32),   # h carry
            pltpu.VMEM((B, H), jnp.float32),   # c carry
        ],
        compiler_params=pltpu.CompilerParams(
            dimension_semantics=("arbitrary",)),   # sequential carry over t
        cost_estimate=cost,
    )(xs, h0, c0, w, b, wa, ba)


def agent_policy_step(x, h, c, w, b, wa, ba):
    """Single policy step (same kernel, T=1) for env-in-the-loop usage."""
    probs, h_new, c_new = agent_policy_rollout(x[None], h, c, w, b, wa, ba)
    return h_new, c_new, probs[0]


def _reference_step(x, h, c, w_ih, w_hh, b_ih, b_hh, w_a, b_a):
    gates = x @ w_ih.T + b_ih + h @ w_hh.T + b_hh
    H = h.shape[-1]
    i = jax.nn.sigmoid(gates[:, 0 * H:1 * H])
    f = jax.nn.sigmoid(gates[:, 1 * H:2 * H])
    g = jnp.tanh(gates[:, 2 * H:3 * H])
    o = jax.nn.sigmoid(gates[:, 3 * H:4 * H])
    c_new = f * c + i * g
    h_new = o * jnp.tanh(c_new)
    logits = h_new @ w_a.T + b_a
    return h_new, c_new, jax.nn.softmax(logits, axis=-1)


if __name__ == "__main__":
    # Small shapes consistent with Agent(__init__) and train_episode's rollout.
    batch_size, state_size, action_size, hidden_size, n_steps = 8, 16, 8, 32, 8

    key = jax.random.PRNGKey(0)
    ks = jax.random.split(key, 8)

    # Deterministic synthetic parameter init (PyTorch LSTMCell/Linear shapes).
    k_lstm = 1.0 / jnp.sqrt(hidden_size)
    w_ih = jax.random.uniform(ks[0], (4 * hidden_size, state_size), jnp.float32, -k_lstm, k_lstm)
    w_hh = jax.random.uniform(ks[1], (4 * hidden_size, hidden_size), jnp.float32, -k_lstm, k_lstm)
    b_ih = jax.random.uniform(ks[2], (4 * hidden_size,), jnp.float32, -k_lstm, k_lstm)
    b_hh = jax.random.uniform(ks[3], (4 * hidden_size,), jnp.float32, -k_lstm, k_lstm)
    w_a = jax.random.uniform(ks[4], (action_size, hidden_size), jnp.float32, -k_lstm, k_lstm)
    b_a = jax.random.uniform(ks[5], (action_size,), jnp.float32, -k_lstm, k_lstm)

    # Example rollout inputs: T states, zero-initialized LSTM memory.
    xs = jax.random.normal(ks[6], (n_steps, batch_size, state_size), jnp.float32)
    h0 = jnp.zeros((batch_size, hidden_size), jnp.float32)
    c0 = jnp.zeros((batch_size, hidden_size), jnp.float32)

    # One-time parameter preprocessing (hoisted out of the step path).
    params = prepare_agent_params(w_ih, w_hh, b_ih, b_hh, w_a, b_a)

    # Fused T-step rollout.
    probs, hT, cT = agent_policy_rollout(xs, h0, c0, *params)
    jax.block_until_ready((probs, hT, cT))

    # Pure-JAX step-by-step reference.
    h_r, c_r = h0, c0
    p_list = []
    for t in range(n_steps):
        h_r, c_r, p_t = _reference_step(xs[t], h_r, c_r,
                                        w_ih, w_hh, b_ih, b_hh, w_a, b_a)
        p_list.append(p_t)
    p_r = jnp.stack(p_list, axis=0)

    assert jnp.allclose(hT, h_r, atol=1e-4), "h mismatch"
    assert jnp.allclose(cT, c_r, atol=1e-4), "c mismatch"
    # approx=True reciprocal -> relaxed softmax tolerances.
    assert jnp.allclose(probs, p_r, atol=5e-3), "probs mismatch"
    assert jnp.allclose(jnp.sum(probs, axis=-1), 1.0, atol=5e-3), "softmax rows must sum to ~1"

    # Single-step API (same kernel, T=1) still matches the per-step reference.
    h1, c1, p1 = agent_policy_step(xs[0], h0, c0, *params)
    jax.block_until_ready((h1, c1, p1))
    h1_r, c1_r, p1_r = _reference_step(xs[0], h0, c0, w_ih, w_hh, b_ih, b_hh, w_a, b_a)
    assert jnp.allclose(h1, h1_r, atol=1e-4), "single-step h mismatch"
    assert jnp.allclose(c1, c1_r, atol=1e-4), "single-step c mismatch"
    assert jnp.allclose(p1, p1_r, atol=5e-3), "single-step probs mismatch"

    # TODO(synk): env interaction, Categorical sampling, and the REINFORCE
    # optimizer update (_optim_step) are host/XLA-level control flow, not
    # kernel work, and are intentionally left outside the Pallas kernel.
    print("KERNEL_OK")
</pallas_src>

<mosaic_0001>
module attributes {stable_mosaic.version = 11 : i64} {
  func.func @agent_rollout_kernel(%arg0: i32, %arg1: memref<1x8x16xf32, #tpu.memory_space<vmem>>, %arg2: memref<8x32xf32, #tpu.memory_space<vmem>>, %arg3: memref<8x32xf32, #tpu.memory_space<vmem>>, %arg4: memref<48x128xf32, #tpu.memory_space<vmem>>, %arg5: memref<1x128xf32, #tpu.memory_space<vmem>>, %arg6: memref<32x8xf32, #tpu.memory_space<vmem>>, %arg7: memref<1x8xf32, #tpu.memory_space<vmem>>, %arg8: memref<1x8x8xf32, #tpu.memory_space<vmem>>, %arg9: memref<8x32xf32, #tpu.memory_space<vmem>>, %arg10: memref<8x32xf32, #tpu.memory_space<vmem>>, %arg11: memref<8x32xf32, #tpu.memory_space<vmem>>, %arg12: memref<8x32xf32, #tpu.memory_space<vmem>>) attributes {dimension_semantics = [#tpu.dimension_semantics<arbitrary>], iteration_bounds = array<i64: 8>, scalar_prefetch = 0 : i64, scratch_operands = 2 : i64, tpu.core_type = #tpu.core_type<tc>, window_params = [{transform_indices = @transform_0, window_bounds = array<i64: 1, 8, 16>}, {pipeline_mode = #tpu.pipeline_mode<synchronous>, transform_indices = @transform_1, window_bounds = array<i64: 8, 32>}, {pipeline_mode = #tpu.pipeline_mode<synchronous>, transform_indices = @transform_2, window_bounds = array<i64: 8, 32>}, {pipeline_mode = #tpu.pipeline_mode<synchronous>, transform_indices = @transform_3, window_bounds = array<i64: 48, 128>}, {pipeline_mode = #tpu.pipeline_mode<synchronous>, transform_indices = @transform_4, window_bounds = array<i64: 1, 128>}, {pipeline_mode = #tpu.pipeline_mode<synchronous>, transform_indices = @transform_5, window_bounds = array<i64: 32, 8>}, {pipeline_mode = #tpu.pipeline_mode<synchronous>, transform_indices = @transform_6, window_bounds = array<i64: 1, 8>}, {transform_indices = @transform_7, window_bounds = array<i64: 1, 8, 8>}, {pipeline_mode = #tpu.pipeline_mode<synchronous>, transform_indices = @transform_8, window_bounds = array<i64: 8, 32>}, {pipeline_mode = #tpu.pipeline_mode<synchronous>, transform_indices = @transform_9, window_bounds = array<i64: 8, 32>}]} {
    %c0_i32 = arith.constant 0 : i32
    %0 = arith.cmpi eq, %arg0, %c0_i32 : i32
    %1 = arith.extui %0 : i1 to i32
    %c0_i32_0 = arith.constant 0 : i32
    %2 = arith.cmpi ne, %1, %c0_i32_0 : i32
    scf.if %2 {
      %c0_28 = arith.constant 0 : index
      %c0_29 = arith.constant 0 : index
      %61 = vector.load %arg2[%c0_28, %c0_29] : memref<8x32xf32, #tpu.memory_space<vmem>>, vector<8x32xf32>
      %c0_30 = arith.constant 0 : index
      %c0_31 = arith.constant 0 : index
      %62 = vector.load %arg11[%c0_30, %c0_31] : memref<8x32xf32, #tpu.memory_space<vmem>>, vector<8x32xf32>
      tpu.vector_store %arg11[%c0_30, %c0_31], %61 {strides = array<i32>} : memref<8x32xf32, #tpu.memory_space<vmem>>, vector<8x32xf32>,
      %c0_32 = arith.constant 0 : index
      %c0_33 = arith.constant 0 : index
      %63 = vector.load %arg3[%c0_32, %c0_33] : memref<8x32xf32, #tpu.memory_space<vmem>>, vector<8x32xf32>
      %c0_34 = arith.constant 0 : index
      %c0_35 = arith.constant 0 : index
      %64 = vector.load %arg12[%c0_34, %c0_35] : memref<8x32xf32, #tpu.memory_space<vmem>>, vector<8x32xf32>
      tpu.vector_store %arg12[%c0_34, %c0_35], %63 {strides = array<i32>} : memref<8x32xf32, #tpu.memory_space<vmem>>, vector<8x32xf32>,
    } else {
    }
    %c0 = arith.constant 0 : index
    %c0_1 = arith.constant 0 : index
    %c0_2 = arith.constant 0 : index
    %3 = vector.load %arg1[%c0, %c0_1, %c0_2] : memref<1x8x16xf32, #tpu.memory_space<vmem>>, vector<1x8x16xf32>
    %4 = vector.shape_cast %3 : vector<1x8x16xf32> to vector<8x16xf32>
    %c0_3 = arith.constant 0 : index
    %c0_4 = arith.constant 0 : index
    %5 = vector.load %arg11[%c0_3, %c0_4] : memref<8x32xf32, #tpu.memory_space<vmem>>, vector<8x32xf32>
    %c0_5 = arith.constant 0 : index
    %c0_6 = arith.constant 0 : index
    %6 = vector.load %arg12[%c0_5, %c0_6] : memref<8x32xf32, #tpu.memory_space<vmem>>, vector<8x32xf32>
    %c0_7 = arith.constant 0 : index
    %c0_8 = arith.constant 0 : index
    %7 = vector.load %arg4[%c0_7, %c0_8] : memref<48x128xf32, #tpu.memory_space<vmem>>, vector<48x128xf32>
    %8 = vector.extract_strided_slice %7 {offsets = [0, 0], sizes = [16, 128], strides = [1, 1]} : vector<48x128xf32> to vector<16x128xf32>
    %cst = arith.constant dense<0.000000e+00> : vector<8x128xf32>
    %9 = tpu.matmul %4, %8, %cst {dimension_numbers = #tpu.dot_dimension_numbers<[1], [0], [0], [1], [0, 0, 1, 1], [], []>} : vector<8x16xf32>, vector<16x128xf32>, vector<8x128xf32> -> vector<8x128xf32>
    %10 = vector.extract_strided_slice %7 {offsets = [16, 0], sizes = [32, 128], strides = [1, 1]} : vector<48x128xf32> to vector<32x128xf32>
    %cst_9 = arith.constant dense<0.000000e+00> : vector<8x128xf32>
    %11 = tpu.matmul %5, %10, %cst_9 {dimension_numbers = #tpu.dot_dimension_numbers<[1], [0], [0], [1], [0, 0, 1, 1], [], []>} : vector<8x32xf32>, vector<32x128xf32>, vector<8x128xf32> -> vector<8x128xf32>
    %12 = arith.addf %9, %11 : vector<8x128xf32>
    %c0_10 = arith.constant 0 : index
    %c0_11 = arith.constant 0 : index
    %13 = vector.load %arg5[%c0_10, %c0_11] : memref<1x128xf32, #tpu.memory_space<vmem>>, vector<1x128xf32>
    %14 = vector.broadcast %13 : vector<1x128xf32> to vector<8x128xf32>
    %15 = arith.addf %12, %14 : vector<8x128xf32>
    %16 = arith.negf %15 : vector<8x128xf32>
    %17 = math.exp %16 : vector<8x128xf32>
    %cst_12 = arith.constant 1.000000e+00 : f32
    %18 = vector.broadcast %cst_12 : f32 to vector<8x128xf32>
    %19 = arith.addf %18, %17 : vector<8x128xf32>
    %20 = arith.divf %18, %19 : vector<8x128xf32>
    %21 = math.tanh %15 : vector<8x128xf32>
    %22 = tpu.iota {dimensions = array<i32: 1>} : vector<8x128xi32>
    %c64_i32 = arith.constant 64 : i32
    %23 = vector.broadcast %c64_i32 : i32 to vector<8x128xi32>
    %24 = arith.cmpi sge, %22, %23 : vector<8x128xi32>
    %c96_i32 = arith.constant 96 : i32
    %25 = vector.broadcast %c96_i32 : i32 to vector<8x128xi32>
    %26 = arith.cmpi slt, %22, %25 : vector<8x128xi32>
    %27 = arith.andi %24, %26 : vector<8x128xi1>
    %28 = arith.select %27, %21, %20 : vector<8x128xi1>, vector<8x128xf32>
    %29 = vector.extract_strided_slice %28 {offsets = [0, 0], sizes = [8, 32], strides = [1, 1]} : vector<8x128xf32> to vector<8x32xf32>
    %30 = vector.extract_strided_slice %28 {offsets = [0, 32], sizes = [8, 32], strides = [1, 1]} : vector<8x128xf32> to vector<8x32xf32>
    %31 = vector.extract_strided_slice %28 {offsets = [0, 64], sizes = [8, 32], strides = [1, 1]} : vector<8x128xf32> to vector<8x32xf32>
    %32 = vector.extract_strided_slice %28 {offsets = [0, 96], sizes = [8, 32], strides = [1, 1]} : vector<8x128xf32> to vector<8x32xf32>
    %33 = arith.mulf %30, %6 : vector<8x32xf32>
    %34 = arith.mulf %29, %31 : vector<8x32xf32>
    %35 = arith.addf %33, %34 : vector<8x32xf32>
    %36 = math.tanh %35 : vector<8x32xf32>
    %37 = arith.mulf %32, %36 : vector<8x32xf32>
    %c0_13 = arith.constant 0 : index
    %c0_14 = arith.constant 0 : index
    %38 = vector.load %arg6[%c0_13, %c0_14] : memref<32x8xf32, #tpu.memory_space<vmem>>, vector<32x8xf32>
    %cst_15 = arith.constant dense<0.000000e+00> : vector<8x8xf32>
    %39 = tpu.matmul %37, %38, %cst_15 {dimension_numbers = #tpu.dot_dimension_numbers<[1], [0], [0], [1], [0, 0, 1, 1], [], []>} : vector<8x32xf32>, vector<32x8xf32>, vector<8x8xf32> -> vector<8x8xf32>
    %c0_16 = arith.constant 0 : index
    %c0_17 = arith.constant 0 : index
    %40 = vector.load %arg7[%c0_16, %c0_17] : memref<1x8xf32, #tpu.memory_space<vmem>>, vector<1x8xf32>
    %41 = vector.broadcast %40 : vector<1x8xf32> to vector<8x8xf32>
    %42 = arith.addf %39, %41 : vector<8x8xf32>
    %cst_18 = arith.constant dense<0xFF800000> : vector<8xf32>
    %43 = vector.multi_reduction <maximumf>, %42, %cst_18 [1] : vector<8x8xf32> to vector<8xf32>
    %44 = vector.shape_cast %43 : vector<8xf32> to vector<8x1xf32>
    %45 = vector.broadcast %44 : vector<8x1xf32> to vector<8x8xf32>
    %46 = arith.subf %42, %45 : vector<8x8xf32>
    %47 = math.exp %46 : vector<8x8xf32>
    %cst_19 = arith.constant dense<0.000000e+00> : vector<8xf32>
    %48 = vector.multi_reduction <add>, %47, %cst_19 [1] : vector<8x8xf32> to vector<8xf32>
    %49 = vector.shape_cast %48 : vector<8xf32> to vector<8x1xf32>
    %50 = tpu.reciprocal %49 {approx = true} : vector<8x1xf32> -> vector<8x1xf32>
    %51 = vector.broadcast %50 : vector<8x1xf32> to vector<8x8xf32>
    %52 = arith.mulf %47, %51 : vector<8x8xf32>
    %c0_20 = arith.constant 0 : index
    %c0_21 = arith.constant 0 : index
    %53 = vector.load %arg11[%c0_20, %c0_21] : memref<8x32xf32, #tpu.memory_space<vmem>>, vector<8x32xf32>
    tpu.vector_store %arg11[%c0_20, %c0_21], %37 {strides = array<i32>} : memref<8x32xf32, #tpu.memory_space<vmem>>, vector<8x32xf32>,
    %c0_22 = arith.constant 0 : index
    %c0_23 = arith.constant 0 : index
    %54 = vector.load %arg12[%c0_22, %c0_23] : memref<8x32xf32, #tpu.memory_space<vmem>>, vector<8x32xf32>
    tpu.vector_store %arg12[%c0_22, %c0_23], %35 {strides = array<i32>} : memref<8x32xf32, #tpu.memory_space<vmem>>, vector<8x32xf32>,
    %c0_24 = arith.constant 0 : index
    %c0_25 = arith.constant 0 : index
    %c0_26 = arith.constant 0 : index
    %55 = vector.load %arg8[%c0_24, %c0_25, %c0_26] : memref<1x8x8xf32, #tpu.memory_space<vmem>>, vector<1x8x8xf32>
    %56 = vector.shape_cast %55 : vector<1x8x8xf32> to vector<8x8xf32>
    %57 = vector.shape_cast %52 : vector<8x8xf32> to vector<1x8x8xf32>
    tpu.vector_store %arg8[%c0_24, %c0_25, %c0_26], %57 {strides = array<i32>} : memref<1x8x8xf32, #tpu.memory_space<vmem>>, vector<1x8x8xf32>,
    %c7_i32 = arith.constant 7 : i32
    %58 = arith.cmpi eq, %arg0, %c7_i32 : i32
    %59 = arith.extui %58 : i1 to i32
    %c0_i32_27 = arith.constant 0 : i32
    %60 = arith.cmpi ne, %59, %c0_i32_27 : i32
    scf.if %60 {
      %c0_28 = arith.constant 0 : index
      %c0_29 = arith.constant 0 : index
      %61 = vector.load %arg11[%c0_28, %c0_29] : memref<8x32xf32, #tpu.memory_space<vmem>>, vector<8x32xf32>
      %c0_30 = arith.constant 0 : index
      %c0_31 = arith.constant 0 : index
      %62 = vector.load %arg9[%c0_30, %c0_31] : memref<8x32xf32, #tpu.memory_space<vmem>>, vector<8x32xf32>
      tpu.vector_store %arg9[%c0_30, %c0_31], %61 {strides = array<i32>} : memref<8x32xf32, #tpu.memory_space<vmem>>, vector<8x32xf32>,
      %c0_32 = arith.constant 0 : index
      %c0_33 = arith.constant 0 : index
      %63 = vector.load %arg12[%c0_32, %c0_33] : memref<8x32xf32, #tpu.memory_space<vmem>>, vector<8x32xf32>
      %c0_34 = arith.constant 0 : index
      %c0_35 = arith.constant 0 : index
      %64 = vector.load %arg10[%c0_34, %c0_35] : memref<8x32xf32, #tpu.memory_space<vmem>>, vector<8x32xf32>
      tpu.vector_store %arg10[%c0_34, %c0_35], %63 {strides = array<i32>} : memref<8x32xf32, #tpu.memory_space<vmem>>, vector<8x32xf32>,
    } else {
    }
    return
  }
  func.func @transform_0(%arg0: i32) -> (i32, i32, i32) {
    %c0_i32 = arith.constant 0 : i32
    %c0_i32_0 = arith.constant 0 : i32
    %c0_i32_1 = arith.constant 0 : i32
    return %arg0, %c0_i32, %c0_i32_0 : i32, i32, i32
  }
  func.func @transform_1(%arg0: i32) -> (i32, i32) {
    %c0_i32 = arith.constant 0 : i32
    %c0_i32_0 = arith.constant 0 : i32
    %c0_i32_1 = arith.constant 0 : i32
    return %c0_i32, %c0_i32_0 : i32, i32
  }
  func.func @transform_2(%arg0: i32) -> (i32, i32) {
    %c0_i32 = arith.constant 0 : i32
    %c0_i32_0 = arith.constant 0 : i32
    %c0_i32_1 = arith.constant 0 : i32
    return %c0_i32, %c0_i32_0 : i32, i32
  }
  func.func @transform_3(%arg0: i32) -> (i32, i32) {
    %c0_i32 = arith.constant 0 : i32
    %c0_i32_0 = arith.constant 0 : i32
    %c0_i32_1 = arith.constant 0 : i32
    return %c0_i32, %c0_i32_0 : i32, i32
  }
  func.func @transform_4(%arg0: i32) -> (i32, i32) {
    %c0_i32 = arith.constant 0 : i32
    %c0_i32_0 = arith.constant 0 : i32
    %c0_i32_1 = arith.constant 0 : i32
    return %c0_i32, %c0_i32_0 : i32, i32
  }
  func.func @transform_5(%arg0: i32) -> (i32, i32) {
    %c0_i32 = arith.constant 0 : i32
    %c0_i32_0 = arith.constant 0 : i32
    %c0_i32_1 = arith.constant 0 : i32
    return %c0_i32, %c0_i32_0 : i32, i32
  }
  func.func @transform_6(%arg0: i32) -> (i32, i32) {
    %c0_i32 = arith.constant 0 : i32
    %c0_i32_0 = arith.constant 0 : i32
    %c0_i32_1 = arith.constant 0 : i32
    return %c0_i32, %c0_i32_0 : i32, i32
  }
  func.func @transform_7(%arg0: i32) -> (i32, i32, i32) {
    %c0_i32 = arith.constant 0 : i32
    %c0_i32_0 = arith.constant 0 : i32
    %c0_i32_1 = arith.constant 0 : i32
    return %arg0, %c0_i32, %c0_i32_0 : i32, i32, i32
  }
  func.func @transform_8(%arg0: i32) -> (i32, i32) {
    %c0_i32 = arith.constant 0 : i32
    %c0_i32_0 = arith.constant 0 : i32
    %c0_i32_1 = arith.constant 0 : i32
    return %c0_i32, %c0_i32_0 : i32, i32
  }
  func.func @transform_9(%arg0: i32) -> (i32, i32) {
    %c0_i32 = arith.constant 0 : i32
    %c0_i32_0 = arith.constant 0 : i32
    %c0_i32_1 = arith.constant 0 : i32
    return %c0_i32, %c0_i32_0 : i32, i32
  }
}

</mosaic_0001>

<bundles_post_ra>
// kernel: agent_policy_rollout.1
= control target key start
LH: loop header
LB: loop body
LE: loop exit
PB: predicated region body
PF: predicated region fallthrough
CT: control target
= control target key end

     0   :  { %s1444_s0 = inlined_call_operand.hbm [shape: f32[8,8,16], index: 0, kind: input, shape index: {}]   ;;  %s1445_s1 = inlined_call_operand.vmem [shape: f32[8,32], index: 1, kind: input, shape index: {}]   ;;  %s1446_s2 = inlined_call_operand.vmem [shape: f32[8,32], index: 2, kind: input, shape index: {}]   ;;  %s1447_s3 = inlined_call_operand.hbm [shape: f32[48,128], index: 3, kind: input, shape index: {}]   ;;  %s1448_s4 = inlined_call_operand.vmem [shape: f32[1,128], index: 4, kind: input, shape index: {}]   ;;  %s1449_s5 = inlined_call_operand.vmem [shape: f32[32,8], index: 5, kind: input, shape index: {}]   ;;  %s1450_s6 = inlined_call_operand.vmem [shape: f32[1,8], index: 6, kind: input, shape index: {}]   ;;  %s1451_s7 = inlined_call_operand.hbm [shape: f32[8,8,8], index: 7, kind: output, shape index: {0}]   ;;  %s1452_s8 = inlined_call_operand.hbm [shape: f32[8,32], index: 8, kind: output, shape index: {1}]   ;;  %s1453_s9 = inlined_call_operand.hbm [shape: f32[8,32], index: 9, kind: output, shape index: {2}]  }
   0x1   :  { %1461 = sst [smem:[#allocation20_spill]] %s1447_s3 }
   0x2   :  { %15 = vsyncpa [#allocation5], 0 }
   0x3   :  { %17 = vsyncpa [#allocation5 + $0x1], 0 }
   0x4   :  { %18 = vsyncpa [#allocation8], 0 }
   0x5   :  { %19 = vsyncpa [#allocation6], 0 }
   0x6   :  { %21 = vsyncpa [#allocation6 + $0x1], 0 }
   0x7   :  { %22 = vsyncpa [#allocation11], 0  ;;  %s1214_s30 = smov 0   ;;  %s1216_s10 = smov 0  }
   0x8   :  { %s1218_s11 = smov 0   ;;  %s1220_s12 = smov 0  }
   0x9 LB: > { %s1235_s13 = sadd.s32 4294967295, %s1150_s12   ;;  %s818_s14 = sadd.s32 4294967294, %s1150_s12   ;;  %s1150_s12 = sphi %s1220_s12, %s1487_s12   ;;  %s1146_s11 = sphi %s1218_s11, %s1491_s11   ;;  %s1142_s10 = sphi %s1216_s10, %s1490_s10   ;;  %s1138_s30 = sphi %s1214_s30, %s1489_s30  }
   0xa   : > { %p48_p0 = scmp.ne.s32.totalorder %s1142_s10, %s1138_s30  ;;  %p1457_p1 = scmp.eq.s32.totalorder %s1235_s13, 0 }
   0xb   : > { %p204_p3 = scmp.eq.s32.totalorder %s818_s14, 7  ;;  %p819_p5 = scmp.ge.s32.totalorder %s1150_s12, 1 }
   0xc   : > { %p1244_p4 = por %p1457_p1, %p48_p0  ;;  %p253_p7 = scmp.lt.s32.totalorder %s1150_s12, 9 }
   0xd   : > { %p1249_p6 = por %p204_p3, %p48_p0  ;;  %s1152_s18 = smov [#allocation7]  }
   0xe   : > { %s1462_s15 = scalar_select %p1244_p4, 1, 0 }
   0xf   : > { %s1463_s16 = scalar_select %p1249_p6, 1, 0 }
  0x10   : > { %p1255_p9 = pnand %p819_p5, %p253_p7  ;;  %s271_s19 = sshll.u32 %s1152_s18, 4  ;;  %s272_s19 = int_to_ptr.vmem [resolvable:$true] %s271_s19 }
  0x11   : > { %1464 = sst [smem:[#allocation17_spill]] %s1463_s16  ;;  %s1268_s21 = sadd.s32 1, %s1150_s12  }
  0x12   : > { %s1465_s17 = scalar_select %p1255_p9, 1, 0 }
  0x13   : > { %p902_p10 = pneg %p1255_p9  ;;  %1467 = sst [smem:[#allocation18_spill]] %s1268_s21 }
  0x14   : > { %s35_s22 = sadd.s32 1, %s1146_s11  ;;  %s32_s23 = ssub.s32 %s1150_s12, %s1268_s21 }
  0x15   : > { %p1263_p11 = pnand %p902_p10, %p1457_p1  ;;  %s987_s24 = scalar_lea.vmem %s272_s19, 768 }
  0x16   : > { %p988_p13 = scmp.ne.s32.totalorder %s272_s19, %s987_s24  ;;  %p995_p5 = scmp.lt.s32.totalorder %s272_s19, %s272_s19 }
  0x17   : > { %p978_p12 = pneg %p1263_p11  ;;  %p996_p7 = scmp.lt.s32.totalorder %s987_s24, %s987_s24 }
  0x19   : > { %p990_p0 = pnand %p988_p13, %p978_p12  ;;  %p997_p8 = por %p996_p7, %p995_p5 }
  0x1b   : > { %p991_p3 = pneg %p990_p0 }
  0x1d   : > { %p998_p2 = pnand %p997_p8, %p991_p3 }
  0x1f   : > { %1001 = shalt.err (!%p998_p2)
}
  0x20   : > { %s1153_s25 = smov 128   ;;  %s1154_s26 = smov 8  }
  0x21   : > { %s1468_s3 = sld [smem:[#allocation20_spill]]  ;;  %p33_p10 = scmp.eq.s32.totalorder %s32_s23, 0 }
  0x22   : > { %p42_p12 = scmp.ne.s32.totalorder %s1146_s11, %s1142_s10  ;;  %p43_p8 = scmp.eq.s32.totalorder %s1150_s12, 0 }
  0x23   : > { %p915_p2 = scmp.lt.s32.totalorder %s1150_s12, 8  ;;  %p1470_p0 = scmp.eq.s32.totalorder %s1235_s13, 7 }
  0x24   : > { %s1285_s29 = scalar_select %p33_p10, %s1146_s11, %s35_s22  }
  0x25   : > { %p44_p13 = por %p43_p8, %p42_p12  ;;  %p1289_p3 = por %p1470_p0, %p42_p12 }
  0x26   : > { %1469 = sst [smem:[#allocation19_spill]] %s1285_s29  ;;  %s294_s18 = sand.u32 1, %s1146_s11  }
  0x27   : > { %905 = dma.hbm_to_vmem [thread:$0]  (!%p1263_p11), %s1468_s3, 768, %s272_s19, [#allocation8], %s1153_s25, %s1153_s25, %s1154_s26  }
  0x28   : > { %s1471_s14 = scalar_select %p1289_p3, 1, 0 }
  0x29   : > { %s823_s24 = sshll.u32 %s1150_s12, 7  ;;  %s822_s21 = sshll.u32 %s294_s18, 3 }
  0x2a   : > { %s1298_s27 = scalar_lea.hbm %s1444_s0, %s823_s24  ;;  %s298_s19 = scalar_lea.vmem [#allocation4], %s822_s21 }
  0x2b   : > { %s305_s22 = sshll.u32 %s298_s19, 4  ;;  %p1300_p11 = pnand %p915_p2, %p44_p13  ;;  %s306_s22 = int_to_ptr.vmem [resolvable:$true] %s305_s22 }
  0x2c   : > { %s295_s25 = scalar_lea.sflag [#allocation5], %s294_s18  ;;  %s1002_s26 = scalar_lea.hbm %s1298_s27, 128 }
  0x2d   : > { %p1003_p5 = scmp.ne.s32.totalorder %s1298_s27, %s1002_s26  ;;  %p1004_p7 = pneg %p1300_p11 }
  0x2e   : > { %s1007_s24 = scalar_lea.hbm %s1444_s0, 1024  ;;  %p1008_p8 = scmp.lt.s32.totalorder %s1298_s27, %s1444_s0 }
  0x2f   : > { %p1005_p10 = pnand %p1004_p7, %p1003_p5  ;;  %p1009_p2 = scmp.lt.s32.totalorder %s1007_s24, %s1002_s26 }
  0x31   : > { %p1006_p12 = pneg %p1005_p10  ;;  %p1010_p13 = por %p1009_p2, %p1008_p8 }
  0x33   : > { %p1011_p0 = pnand %p1010_p13, %p1006_p12 }
  0x35   : > { %1014 = shalt.err (!%p1011_p0)
}
  0x36   : > { %s1015_s19 = scalar_lea.vmem %s306_s22, 128  ;;  %s1155_s18 = smov [#allocation4]  }
  0x37   : > { %p1016_p1 = scmp.ne.s32.totalorder %s306_s22, %s1015_s19  ;;  %s1020_s3 = sshll.u32 %s1155_s18, 4  ;;  %s1021_s3 = int_to_ptr.vmem [resolvable:$false] %s1020_s3 }
  0x38   : > { %s1022_s29 = scalar_lea.vmem %s1021_s3, 256  ;;  %p1023_p5 = scmp.lt.s32.totalorder %s306_s22, %s1021_s3 }
  0x39   : > { %p1018_p6 = pnand %p1016_p1, %p1004_p7  ;;  %p1024_p10 = scmp.lt.s32.totalorder %s1022_s29, %s1015_s19 }
  0x3b   : > { %p1019_p3 = pneg %p1018_p6  ;;  %p1025_p4 = por %p1024_p10, %p1023_p5 }
  0x3d   : > { %p1026_p9 = pnand %p1025_p4, %p1019_p3 }
  0x3f   : > { %1029 = shalt.err (!%p1026_p9)
}
  0x40   : > { %909 = dma.hbm_to_vmem [thread:$0]  (!%p1300_p11), %s1298_s27, 128, %s306_s22, %s295_s25  }
  0x41   : > { %p1473_p12 = scmp.ne.s32.totalorder %s1465_s17, 0 }
  0x42   : > { %s1321_s26 = sand.u32 (!%p1473_p12), 1, %s1142_s10   ;;  %p1474_p1 = scmp.ne.s32.totalorder (!%p1473_p12), %s1462_s15, 0 }
  0x43   : > { %314 = sbr.rel (%p1473_p12) target bundleno = 1371 (0x55b), region = 48  ;;  %s825_s16 = sshll.u32 (!%p1473_p12), %s1321_s26, 3 }
  0x44   : > { %s317_s28 = scalar_lea.sflag (!%p1473_p12), [#allocation5], %s1321_s26  ;;  %s320_s3 = scalar_lea.vmem (!%p1473_p12), [#allocation4], %s825_s16 }
  0x48   : > { %1121 = dma.done.wait (%p1474_p1), %s317_s28, 128  }
  0x49   : > { %1123 = vsyncadd (%p1474_p1), %s317_s28, 4294967168  ;;  %p1475_p4 = scmp.eq.s32.totalorder %s1235_s13, 0 }
  0x4b   : > { %1125 = dma.done.wait (%p1475_p4), [#allocation8], 768   ;;  %p1476_p6 = pmov %p1475_p4 }
  0x4c   : > { %s1333_s17 = scalar_lea.vmem [#allocation9], %s825_s16  ;;  %p1477_p9 = scmp.ne.s32.totalorder %s1235_s13, 0 }
  0x4d   : > { %1127 = vsyncadd (%p1476_p6), [#allocation8], 4294966528 }
  0x4e   : > { %362 = sbr.rel (%p1477_p9) target bundleno = 86 (0x56), region = 60 }
  0x53   : > { %v363_v0 = vld [vmem:[%s1445_s1] sm:$0xff]  ;;  %vm364_vm0 = vcmask 261120  }
  0x54   : > { %v366_v1 = vld [vmem:[%s1446_s2] sm:$0xff]  ;;  %365 = vst.msk [vmem:[#allocation2] sm:$0xff] %vm364_vm0, %v363_v0 }
  0x55   : > { %367 = vst.msk [vmem:[#allocation3] sm:$0xff] %vm364_vm0, %v366_v1 }
  0x56 PF: > { %v376_v2 = vld [vmem:[#allocation7 + $0x28] sm:$0xff]  ;;  %v1156_v4 = vmov 0.0   ;;  %v375_v5 = vld [vmem:[#allocation7 + $0x20] sm:$0xff]  ;;  %v374_v7 = vld [vmem:[#allocation7 + $0x18] sm:$0xff]  ;;  %vm451_vm1 = vcmask 130048   ;;  %vm1157_vm2 = vmmov 0   ;;  %v540_v21 = vlaneseq }
  0x57   : > { %v372_v3 = vld [vmem:[#allocation7 + $0x8] sm:$0xff]  ;;  %857 = vmatprep.subr.mxu0 %v1156_v4  ;;  %868 = vmatprep.subr.mxu1 %v1156_v4  ;;  %v371_v6 = vld [vmem:[#allocation7] sm:$0xff]  ;;  %v368_v8 = vld [vmem:[%s320_s3] sm:$0xff]  ;;  %vm377_vm3 = vcmask 261120   ;;  %s1158_s24 = smov 64   ;;  %s1159_s20 = smov 32  }
  0x58   : > { %858 = vmatpush3.msra.mxu0 %v376_v2  ;;  %869 = vmatpush3.msra.mxu1 %v372_v3  ;;  %v373_v9 = vld [vmem:[#allocation7 + $0x10] sm:$0xff]  ;;  %v831_v14 = vld [vmem:[%s1448_s4] ss:$0 sm:$0xff]  ;;  %v541_v22 = vand.u32 127, %v540_v21  ;;  %v570_v33 = vld [vmem:[%s1449_s5 + $0x18] sm:$0xff]  ;;  %vm653_vm7 = vcmask 64512  }
  0x59   : > { %859 = vmatprep.subr.mxu0 %v1156_v4  ;;  %870 = vmatprep.subr.mxu1 %v1156_v4  ;;  %v569_v34 = vld [vmem:[%s1449_s5 + $0x10] sm:$0xff]  ;;  %v568_v35 = vld [vmem:[%s1449_s5 + $0x8] sm:$0xff]  ;;  %v567_v36 = vld [vmem:[%s1449_s5] sm:$0xff]  ;;  %s1160_s15 = smov 96   ;;  %p835_p3 = scmp.ne.s32.totalorder %s1235_s13, 7 }
  0x5a   : > { %860 = vmatpush3.msra.mxu0 %v375_v5  ;;  %871 = vmatpush3.msra.mxu1 %v371_v6  ;;  %vm542_vm4 = vcmp.ge.s32.totalorder %v541_v22, 64  ;;  %vm543_vm5 = vcmp.lt.s32.totalorder %v541_v22, 96  ;;  %v833_v41 = vld [vmem:[%s1450_s6] ss:$0 sm:$0xff] }
  0x5b   : > { %861 = vmatprep.subr.mxu0 %v1156_v4  ;;  %872 = vmatprep.mubr.msk.f32.mxu1 %vm1157_vm2, %v1156_v4  ;;  %v369_v10 = vld [vmem:[#allocation2] sm:$0xff]  ;;  %vm544_vm6 = vmand %vm542_vm4, %vm543_vm5 }
  0x5c   : > { %862 = vmatpush3.msra.mxu0 %v374_v7  ;;  %873 = vmatmul.mubr.msk.f32.vlgmr.msra.gmra.mxu1 %vm451_vm1, %v368_v8  ;;  %v370_v26 = vld [vmem:[#allocation3] sm:$0xff] }
  0x5d   : > { %863 = vmatprep.subr.mxu0 %v1156_v4  ;;  %865 = vmatprep.mubr.msk.f32.mxu0 %vm1157_vm2, %v1156_v4 }
  0x5e   : > { %864 = vmatpush3.msra.mxu0 %v373_v9  ;;  %875 = vmatprep.subr.mxu1 %v1156_v4 }
  0x5f   : > { %866 = vmatmul.mubr.msk.f32.vlgmr.msra.gmra.mxu0 %vm377_vm3, %v369_v10  ;;  %883 = vmatprep.mubr.msk.f32.mxu1 %vm1157_vm2, %v1156_v4 }
  0x60   : > { %876 = vmatpush3.msra.mxu1 %v570_v33 }
  0x61   : > { %877 = vmatprep.subr.mxu1 %v1156_v4 }
  0x62   : > { %878 = vmatpush3.msra.mxu1 %v569_v34 }
  0x63   : > { %879 = vmatprep.subr.mxu1 %v1156_v4 }
  0x64   : > { %880 = vmatpush3.msra.mxu1 %v568_v35 }
  0x65   : > { %881 = vmatprep.subr.mxu1 %v1156_v4 }
  0x66   : > { %882 = vmatpush3.msra.mxu1 %v567_v36 }
 0x11c   : > { %v521_v11 = vpop.f32.mrf.mxu1 }
 0x11e   : > { %v874_v12 = vpop.f32.mrf.mxu1 }
 0x11f   : > { %v447_v13 = vpop.f32.mrf.mxu0 }
 0x120   : > { %v522_v15 = vadd.f32 %v521_v11, %v447_v13 }
 0x121   : > { %v867_v16 = vpop.f32.mrf.mxu0 }
 0x122   : > { %v532_v17 = vadd.f32 %v831_v14, %v522_v15 }
 0x124   : > { %v832_v18 = vmul.f32 -1.442695, %v532_v17 }
 0x126   : > { %964 = vpow2.f32 %v832_v18 }
 0x127   : > { %966 = vtanh.f32 %v532_v17 }
 0x133   : > { %v965_v19 = vpop.eup %964 }
 0x134   : > { %v536_v20 = vadd.f32 1.0, %v965_v19  ;;  %v967_v23 = vpop.eup %966 }
 0x136   : > { %968 = vrcp.f32 %v536_v20 }
 0x143   : > { %v969_v24 = vpop.eup %968 }
 0x144   : > { %v545_v25 = vsel %vm544_vm6, %v967_v23, %v969_v24 }
 0x145   : > { %552 = vrot.lane.b32.xlu0 %v545_v25, %s1158_s24 }
 0x149   : > { %547 = vrot.lane.b32.xlu0 %v370_v26, %s1159_s20 }
 0x1b7   : > { %v553_v27 = vpop.permute.xlu0 %552 }
 0x1b8   : > { %v555_v28 = vmul.f32 %v553_v27, %v545_v25 }
 0x1ba   : > { %557 = vrot.lane.b32.xlu1 %v555_v28, %s1159_s20 }
 0x1bb   : > { %v548_v29 = vpop.permute.xlu0 %547 }
 0x1bc   : > { %v550_v30 = vmul.f32 %v548_v29, %v545_v25 }
 0x22c   : > { %v558_v31 = vpop.permute.xlu1 %557 }
 0x22d   : > { %v560_v32 = vadd.f32 %v558_v31, %v550_v30 }
 0x22f   : > { %970 = vtanh.f32 %v560_v32 }
 0x23c   : > { %v971_v37 = vpop.eup %970 }
 0x23d   : > { %563 = vrot.lane.b32.xlu1 %v971_v37, %s1158_s24 }
 0x2af   : > { %v564_v38 = vpop.permute.xlu1 %563 }
 0x2b0   : > { %v566_v39 = vmul.f32 %v564_v38, %v545_v25 }
 0x2b2   : > { %579 = vrot.lane.b32.xlu0 %v566_v39, %s1159_s20 }
 0x324   : > { %v580_v40 = vpop.permute.xlu0 %579 }
 0x325   : > { %666 = vst.msk [vmem:[#allocation2] sm:$0xff] %vm377_vm3, %v580_v40  ;;  %884 = vmatmul.mubr.msk.f32.vlgmr.msra.gmra.mxu1 %vm377_vm3, %v580_v40 }
 0x3e5   : > { %v649_v42 = vpop.f32.mrf.mxu1 }
 0x3e6   : > { %v650_v43 = vadd.f32 %v833_v41, %v649_v42 }
 0x3e7   : > { %v885_v44 = vpop.f32.mrf.mxu1 }
 0x3e8   : > { %v654_v45 = vsel %vm653_vm7, %v650_v43, -inf }
 0x3e9   : > { %655 = vmax.xlane.f32.xlu1 %v654_v45 }
 0x472   : > { %v656_v46 = vpop.xlane.xlu1 %655 }
 0x473   : > { %v657_v47 = vsub.f32 %v650_v43, %v656_v46 }
 0x475   : > { %v658_v48 = vmul.f32 1.442695, %v657_v47 }
 0x477   : > { %972 = vpow2.f32 %v658_v48 }
 0x484   : > { %v973_v49 = vpop.eup %972 }
 0x485   : > { %v660_v50 = vsel %vm653_vm7, %v973_v49, 0.0 }
 0x486   : > { %661 = vadd.xlane.f32.xlu0 %v660_v50 }
 0x49c   : > { %668 = vrot.lane.b32.xlu0 %v560_v32, %s1160_s15 }
 0x50f   : > { %v662_v51 = vpop.xlane.xlu0 %661 }
 0x510   : > { %974 = vrcp.f32 %v662_v51 }
 0x513   : > { %v669_v52 = vpop.permute.xlu0 %668 }
 0x514   : > { %671 = vst.msk [vmem:[#allocation3] sm:$0xff] %vm377_vm3, %v669_v52 }
 0x51c   : > { %676 = sbr.rel (%p835_p3) target bundleno = 1315 (0x523), region = 64 }
 0x51d   : > { %v975_v53 = vpop.eup %974 }
 0x51e   : > { %v664_v54 = vmul.f32 %v975_v53, %v973_v49 }
 0x520   : > { %672 = vst.msk [vmem:[%s1333_s17] sm:$0xff] %vm653_vm7, %v664_v54 }
 0x521   : > { %v677_v55 = vld [vmem:[#allocation2] sm:$0xff]  ;;  %v679_v56 = vld [vmem:[#allocation3] sm:$0xff] }
 0x522   : > { %678 = vst.msk [vmem:[#allocation10] sm:$0xff] %vm377_vm3, %v677_v55  ;;  %680 = vst.msk [vmem:[#allocation12] sm:$0xff] %vm377_vm3, %v679_v56 }
 0x523 PF: > { %s1161_s25 = smov [#allocation10]   ;;  %s837_s20 = sshll.u32 %s1235_s13, 7 }
 0x524   : > { %s706_s24 = sshll.u32 %s1161_s25, 4  ;;  %s1389_s18 = scalar_lea.hbm %s1451_s7, %s837_s20  ;;  %s707_s24 = int_to_ptr.vmem [resolvable:$true] %s706_s24 }
 0x525   : > { %s1030_s16 = scalar_lea.vmem %s707_s24, 128  ;;  %p1478_p7 = scmp.eq.s32.totalorder %s1235_s13, 7 }
 0x526   : > { %p1031_p11 = scmp.ne.s32.totalorder %s707_s24, %s1030_s16  ;;  %p1037_p13 = scmp.lt.s32.totalorder %s707_s24, %s707_s24 }
 0x527   : > { %p1038_p0 = scmp.lt.s32.totalorder %s1030_s16, %s1030_s16 }
 0x528   : > { %p1032_p8 = pnand %p1031_p11, %p1478_p7 }
 0x529   : > { %p1039_p5 = por %p1038_p0, %p1037_p13 }
 0x52a   : > { %p1033_p2 = pneg %p1032_p8 }
 0x52c   : > { %p1040_p10 = pnand %p1039_p5, %p1033_p2 }
 0x52e   : > { %1043 = shalt.err (!%p1040_p10)
}
 0x52f   : > { %p1479_p12 = pmov %p1478_p7  ;;  %s695_s29 = sshll.u32 %s1333_s17, 4  ;;  %s696_s29 = int_to_ptr.vmem [resolvable:$true] %s695_s29 }
 0x530   : > { %s1162_s27 = smov [#allocation12]   ;;  %s682_s23 = scalar_lea.sflag [#allocation6], %s1321_s26 }
 0x531   : > { %894 = dma.vmem_to_hbm [thread:$0]  (%p1479_p12), %s707_s24, 128, %s1452_s8, [#allocation11]  }
 0x532   : > { %s717_s22 = sshll.u32 %s1162_s27, 4  ;;  %s1054_s15 = scalar_lea.vmem %s696_s29, 128  ;;  %s718_s22 = int_to_ptr.vmem [resolvable:$true] %s717_s22 }
 0x533   : > { %p1055_p1 = scmp.ne.s32.totalorder %s696_s29, %s1054_s15  ;;  %p1480_p4 = scmp.ne.s32.totalorder %s1471_s14, 0 }
 0x534   : > { %s1163_s25 = smov [#allocation9]  }
 0x535   : > { %p1056_p6 = pnand %p1055_p1, %p1480_p4  ;;  %s1058_s20 = sshll.u32 %s1163_s25, 4  ;;  %s1059_s20 = int_to_ptr.vmem [resolvable:$false] %s1058_s20 }
 0x536   : > { %s1060_s21 = scalar_lea.vmem %s1059_s20, 256  ;;  %p1061_p3 = scmp.lt.s32.totalorder %s696_s29, %s1059_s20 }
 0x537   : > { %p1057_p9 = pneg %p1056_p6  ;;  %p1062_p11 = scmp.lt.s32.totalorder %s1060_s21, %s1054_s15 }
 0x539   : > { %p1063_p7 = por %p1062_p11, %p1061_p3 }
 0x53b   : > { %p1064_p8 = pnand %p1063_p7, %p1057_p9 }
 0x53d   : > { %1067 = shalt.err (!%p1064_p8)
}
 0x53e   : > { %s1068_s17 = scalar_lea.hbm %s1389_s18, 128  ;;  %s1072_s19 = scalar_lea.hbm %s1451_s7, 1024 }
 0x53f   : > { %p1069_p2 = scmp.ne.s32.totalorder %s1389_s18, %s1068_s17  ;;  %p1073_p5 = scmp.lt.s32.totalorder %s1389_s18, %s1451_s7 }
 0x540   : > { %p1074_p10 = scmp.lt.s32.totalorder %s1072_s19, %s1068_s17 }
 0x541   : > { %p1070_p13 = pnand %p1069_p2, %p1480_p4 }
 0x542   : > { %p1075_p12 = por %p1074_p10, %p1073_p5 }
 0x543   : > { %p1071_p0 = pneg %p1070_p13 }
 0x545   : > { %p1076_p1 = pnand %p1075_p12, %p1071_p0 }
 0x547   : > { %1079 = shalt.err (!%p1076_p1)
}
 0x548   : > { %892 = dma.vmem_to_hbm [thread:$0]  (%p1480_p4), %s696_s29, 128, %s1389_s18, %s682_s23  }
 0x549   : > { %s1080_s3 = scalar_lea.vmem %s718_s22, 128  ;;  %p1481_p9 = scmp.eq.s32.totalorder %s1235_s13, 7 }
 0x54a   : > { %p1081_p6 = scmp.ne.s32.totalorder %s718_s22, %s1080_s3  ;;  %p1087_p7 = scmp.lt.s32.totalorder %s718_s22, %s718_s22 }
 0x54b   : > { %p1088_p8 = scmp.lt.s32.totalorder %s1080_s3, %s1080_s3 }
 0x54c   : > { %p1082_p3 = pnand %p1081_p6, %p1481_p9 }
 0x54d   : > { %p1089_p2 = por %p1088_p8, %p1087_p7 }
 0x54e   : > { %p1083_p11 = pneg %p1082_p3 }
 0x550   : > { %p1090_p13 = pnand %p1089_p2, %p1083_p11 }
 0x552   : > { %1093 = shalt.err (!%p1090_p13)
}
 0x553   : > { %p1482_p5 = pmov %p1481_p9 }
 0x555   : > { %896 = dma.vmem_to_hbm [thread:$0]  (%p1482_p5), %s718_s22, 128, %s1453_s9, [#allocation11]  }
 0x556   : > { %p1483_p0 = pmov %p1482_p5 }
 0x558   : > { %1129 = dma.done.wait (%p1483_p0), [#allocation11], 256   ;;  %p1484_p4 = pmov %p1483_p0 }
 0x55a   : > { %1131 = vsyncadd (%p1484_p4), [#allocation11], 4294967040 }
 0x55b PF: > { %s1485_s14 = sld [smem:[#allocation17_spill]]  ;;  %p921_p10 = scmp.ge.s32.totalorder %s1150_s12, 2 }
 0x55c   : > { %s737_s18 = sand.u32 1, %s1138_s30  }
 0x55d   : > { %s738_s29 = scalar_lea.sflag [#allocation6], %s737_s18 }
 0x561   : > { %p1486_p12 = scmp.ne.s32.totalorder %s1485_s14, 0 }
 0x563   : > { %p911_p1 = pnand %p921_p10, %p1486_p12 }
 0x565   : > { %p912_p6 = pneg %p911_p1 }
 0x567   : > { %1133 = dma.done.wait (%p912_p6), %s738_s29, 128  }
 0x568   : > { %1135 = vsyncadd (%p912_p6), %s738_s29, 4294967168  ;;  %s1487_s12 = sld [smem:[#allocation18_spill]]  ;;  %s1489_s30 = smov %s1142_s10 }
 0x569   : > { %s1488_s22 = sld [smem:[#allocation19_spill]]  ;;  %s1490_s10 = smov %s1146_s11 }
 0x56e   : > { %p25_p9 = scmp.ge.s32.totalorder %s1487_s12, 10  }
 0x56f   : > { %s1491_s11 = smov %s1488_s22 }
 0x570   :  { %27 = sbr.rel (!%p25_p9) target bundleno = 9 (0x9), region = 121 }
 0x575   :  { %743 = vsyncpa [#allocation5], 1 }
 0x576   :  { %745 = vsyncpa [#allocation5 + $0x1], 1 }
 0x577   :  { %746 = vsyncpa [#allocation8], 1 }
 0x578   :  { %747 = vsyncpa [#allocation6], 1 }
 0x579   :  { %749 = vsyncpa [#allocation6 + $0x1], 1 }
 0x57a   :  { %750 = vsyncpa [#allocation11], 1 }

</bundles_post_ra>
